<compile_context>
chip_gen: v5e
topology: v5e:2x2
jax: 0.10.0
libtpu: 0.0.40
codegen_flags: <defaults>
</compile_context>

<pallas_src>
import jax
import jax.numpy as jnp
from jax.experimental import pallas as pl
from jax.experimental.pallas import tpu as pltpu


def _rnn_fc_kernel(x_ref, w_ref, b_ref, wfc_ref, bfc_ref, out_ref, xh_ref):
    # x_ref:   (T, B, I)  time-major input
    # w_ref:   (IP+H, H)  fused [W_ih^T (rows 0:I); zeros (I:IP); W_hh^T (IP:IP+H)]
    # b_ref:   (1, H)     b_ih + b_hh
    # wfc_ref: (H, O), bfc_ref: (1, O)
    # out_ref: (T, B, O)
    # xh_ref:  (B, IP+H)  fused [x_t | h_{t-1}] scratch
    T, _, I = x_ref.shape
    H = w_ref.shape[1]
    IP = xh_ref.shape[1] - H  # lane-padded x-segment width (multiple of 128)

    # Zero the fused scratch once: sets h_0 = 0 and the zero-pad lanes [I:IP).
    xh_ref[...] = jnp.zeros_like(xh_ref)

    # Hoist resident weight / bias loads (and their broadcasts) out of the loop.
    w = w_ref[...]      # (IP+H, H)
    b = b_ref[...]      # (1, H)
    wfc = wfc_ref[...]  # (H, O)
    bfc = bfc_ref[...]  # (1, O)

    def step(t, carry):
        # h_t = tanh([x_t | h_{t-1}] @ [W_ih^T ; W_hh^T] + (b_ih + b_hh))
        xh_ref[:, :I] = x_ref[t]                     # x segment (lane offset 0)
        h_new = jnp.tanh(
            jnp.dot(xh_ref[...], w, preferred_element_type=jnp.float32) + b
        )
        xh_ref[:, IP:] = h_new                       # h segment (128-aligned offset)

        # Fused FC head: out_t = h_t @ W_fc^T + b_fc  (off the recurrence path;
        # stays VMEM-resident, single HBM writeback at kernel end).
        out_ref[t] = (
            jnp.dot(h_new, wfc, preferred_element_type=jnp.float32) + bfc
        )
        return carry

    jax.lax.fori_loop(0, T, step, 0, unroll=True)


def rnn_fc_forward(x, w_ih, w_hh, b_ih, b_hh, w_fc, b_fc):
    """x: (B, T, I) float; returns (B, T, O) float32 (matches PyTorch MyModel.forward)."""
    x = x.astype(jnp.float32)
    B, T, I = x.shape
    H = w_ih.shape[0]
    O = w_fc.shape[0]
    IP = ((I + 127) // 128) * 128  # pad x-segment so h-segment is lane-tile aligned

    # Time-major so the kernel indexes the cheap leading dim each step.
    x_tm = jnp.transpose(x, (1, 0, 2))  # (T, B, I)

    # Fused recurrent weight and pre-summed bias.
    w_fused = jnp.zeros((IP + H, H), jnp.float32)
    w_fused = w_fused.at[:I, :].set(jnp.transpose(w_ih).astype(jnp.float32))
    w_fused = w_fused.at[IP:, :].set(jnp.transpose(w_hh).astype(jnp.float32))
    b_fused = (b_ih + b_hh).reshape(1, H).astype(jnp.float32)
    wfc_t = jnp.transpose(w_fc).astype(jnp.float32)  # (H, O)
    bfc2 = b_fc.reshape(1, O).astype(jnp.float32)

    out_tm = pl.pallas_call(
        _rnn_fc_kernel,
        out_shape=jax.ShapeDtypeStruct((T, B, O), jnp.float32),
        grid_spec=pltpu.PrefetchScalarGridSpec(
            num_scalar_prefetch=0,
            grid=(1,),  # whole problem lives in VMEM; recurrence runs in-kernel
            in_specs=[
                pl.BlockSpec((T, B, I), lambda i: (0, 0, 0)),    # x (time-major)
                pl.BlockSpec((IP + H, H), lambda i: (0, 0)),     # fused W (resident)
                pl.BlockSpec((1, H), lambda i: (0, 0)),          # fused bias
                pl.BlockSpec((H, O), lambda i: (0, 0)),          # W_fc^T (resident)
                pl.BlockSpec((1, O), lambda i: (0, 0)),          # b_fc
            ],
            out_specs=pl.BlockSpec((T, B, O), lambda i: (0, 0, 0)),
            scratch_shapes=[pltpu.VMEM((B, IP + H), jnp.float32)],  # [x_t | h] carry
        ),
        compiler_params=pltpu.CompilerParams(
            dimension_semantics=("arbitrary",),
        ),
    )(x_tm, w_fused, b_fused, wfc_t, bfc2)

    return jnp.transpose(out_tm, (1, 0, 2))  # (B, T, O)


def _reference(x, w_ih, w_hh, b_ih, b_hh, w_fc, b_fc):
    """Pure-JAX reference matching torch.nn.RNN(batch_first=True) + Linear."""
    x = x.astype(jnp.float32)
    B, T, I = x.shape
    H = w_ih.shape[0]

    def step(h, x_t):
        h_new = jnp.tanh(x_t @ w_ih.T + b_ih + h @ w_hh.T + b_hh)
        return h_new, h_new

    h0 = jnp.zeros((B, H), jnp.float32)
    _, hs = jax.lax.scan(step, h0, jnp.transpose(x, (1, 0, 2)))  # (T, B, H)
    out = jnp.transpose(hs, (1, 0, 2))  # (B, T, H)
    return out @ w_fc.T + b_fc


if __name__ == "__main__":
    # Small shapes consistent with the module's forward.
    B, T = 2, 8
    input_size, hidden_size, output_size = 16, 32, 8

    key = jax.random.PRNGKey(0)
    kx, k1, k2, k3, k4, k5, k6 = jax.random.split(key, 7)

    x = jax.random.normal(kx, (B, T, input_size), dtype=jnp.float32)

    # Deterministic synthetic parameters (shapes match nn.RNN / nn.Linear).
    scale = 1.0 / jnp.sqrt(hidden_size)
    w_ih = jax.random.uniform(k1, (hidden_size, input_size), minval=-scale, maxval=scale)
    w_hh = jax.random.uniform(k2, (hidden_size, hidden_size), minval=-scale, maxval=scale)
    b_ih = jax.random.uniform(k3, (hidden_size,), minval=-scale, maxval=scale)
    b_hh = jax.random.uniform(k4, (hidden_size,), minval=-scale, maxval=scale)
    w_fc = jax.random.uniform(k5, (output_size, hidden_size), minval=-scale, maxval=scale)
    b_fc = jax.random.uniform(k6, (output_size,), minval=-scale, maxval=scale)

    out = rnn_fc_forward(x, w_ih, w_hh, b_ih, b_hh, w_fc, b_fc)
    out = jax.block_until_ready(out)

    ref = _reference(x, w_ih, w_hh, b_ih, b_hh, w_fc, b_fc)
    assert out.shape == (B, T, output_size), out.shape
    assert jnp.allclose(out, ref, atol=1e-5, rtol=1e-5), "mismatch vs reference"

    print("KERNEL_OK")
</pallas_src>

<mosaic_0001>
module attributes {stable_mosaic.version = 11 : i64} {
  func.func @_rnn_fc_kernel(%arg0: i32, %arg1: memref<8x2x16xf32, #tpu.memory_space<vmem>>, %arg2: memref<160x32xf32, #tpu.memory_space<vmem>>, %arg3: memref<1x32xf32, #tpu.memory_space<vmem>>, %arg4: memref<32x8xf32, #tpu.memory_space<vmem>>, %arg5: memref<1x8xf32, #tpu.memory_space<vmem>>, %arg6: memref<8x2x8xf32, #tpu.memory_space<vmem>>, %arg7: memref<2x160xf32, #tpu.memory_space<vmem>>) attributes {dimension_semantics = [#tpu.dimension_semantics<arbitrary>], iteration_bounds = array<i64: 1>, scalar_prefetch = 0 : i64, scratch_operands = 1 : i64, tpu.core_type = #tpu.core_type<tc>, window_params = [{pipeline_mode = #tpu.pipeline_mode<synchronous>, transform_indices = @transform_0, window_bounds = array<i64: 8, 2, 16>}, {pipeline_mode = #tpu.pipeline_mode<synchronous>, transform_indices = @transform_1, window_bounds = array<i64: 160, 32>}, {pipeline_mode = #tpu.pipeline_mode<synchronous>, transform_indices = @transform_2, window_bounds = array<i64: 1, 32>}, {pipeline_mode = #tpu.pipeline_mode<synchronous>, transform_indices = @transform_3, window_bounds = array<i64: 32, 8>}, {pipeline_mode = #tpu.pipeline_mode<synchronous>, transform_indices = @transform_4, window_bounds = array<i64: 1, 8>}, {pipeline_mode = #tpu.pipeline_mode<synchronous>, transform_indices = @transform_5, window_bounds = array<i64: 8, 2, 8>}]} {
    %cst = arith.constant 0.000000e+00 : f32
    %0 = vector.broadcast %cst : f32 to vector<2x160xf32>
    %c0 = arith.constant 0 : index
    %c0_0 = arith.constant 0 : index
    %1 = vector.load %arg7[%c0, %c0_0] : memref<2x160xf32, #tpu.memory_space<vmem>>, vector<2x160xf32>
    tpu.vector_store %arg7[%c0, %c0_0], %0 {strides = array<i32>} : memref<2x160xf32, #tpu.memory_space<vmem>>, vector<2x160xf32>,
    %c0_1 = arith.constant 0 : index
    %c0_2 = arith.constant 0 : index
    %2 = vector.load %arg2[%c0_1, %c0_2] : memref<160x32xf32, #tpu.memory_space<vmem>>, vector<160x32xf32>
    %c0_3 = arith.constant 0 : index
    %c0_4 = arith.constant 0 : index
    %3 = vector.load %arg3[%c0_3, %c0_4] : memref<1x32xf32, #tpu.memory_space<vmem>>, vector<1x32xf32>
    %c0_5 = arith.constant 0 : index
    %c0_6 = arith.constant 0 : index
    %4 = vector.load %arg4[%c0_5, %c0_6] : memref<32x8xf32, #tpu.memory_space<vmem>>, vector<32x8xf32>
    %c0_7 = arith.constant 0 : index
    %c0_8 = arith.constant 0 : index
    %5 = vector.load %arg5[%c0_7, %c0_8] : memref<1x8xf32, #tpu.memory_space<vmem>>, vector<1x8xf32>
    %c0_i32 = arith.constant 0 : i32
    %6 = arith.index_cast %c0_i32 : i32 to index
    %c0_9 = arith.constant 0 : index
    %c0_10 = arith.constant 0 : index
    %7 = vector.load %arg1[%6, %c0_9, %c0_10] : memref<8x2x16xf32, #tpu.memory_space<vmem>>, vector<1x2x16xf32>
    %8 = vector.shape_cast %7 : vector<1x2x16xf32> to vector<2x16xf32>
    %c0_11 = arith.constant 0 : index
    %c0_12 = arith.constant 0 : index
    %9 = vector.load %arg7[%c0_11, %c0_12] : memref<2x160xf32, #tpu.memory_space<vmem>>, vector<2x16xf32>
    tpu.vector_store %arg7[%c0_11, %c0_12], %8 {strides = array<i32>} : memref<2x160xf32, #tpu.memory_space<vmem>>, vector<2x16xf32>,
    %c0_13 = arith.constant 0 : index
    %c0_14 = arith.constant 0 : index
    %10 = vector.load %arg7[%c0_13, %c0_14] : memref<2x160xf32, #tpu.memory_space<vmem>>, vector<2x160xf32>
    %cst_15 = arith.constant dense<0.000000e+00> : vector<2x32xf32>
    %11 = tpu.matmul %10, %2, %cst_15 {dimension_numbers = #tpu.dot_dimension_numbers<[1], [0], [0], [1], [0, 0, 1, 1], [], []>} : vector<2x160xf32>, vector<160x32xf32>, vector<2x32xf32> -> vector<2x32xf32>
    %12 = vector.broadcast %3 : vector<1x32xf32> to vector<2x32xf32>
    %13 = arith.addf %11, %12 : vector<2x32xf32>
    %14 = math.tanh %13 : vector<2x32xf32>
    %c0_16 = arith.constant 0 : index
    %c128 = arith.constant 128 : index
    %15 = vector.load %arg7[%c0_16, %c128] : memref<2x160xf32, #tpu.memory_space<vmem>>, vector<2x32xf32>
    tpu.vector_store %arg7[%c0_16, %c128], %14 {strides = array<i32>} : memref<2x160xf32, #tpu.memory_space<vmem>>, vector<2x32xf32>,
    %cst_17 = arith.constant dense<0.000000e+00> : vector<2x8xf32>
    %16 = tpu.matmul %14, %4, %cst_17 {dimension_numbers = #tpu.dot_dimension_numbers<[1], [0], [0], [1], [0, 0, 1, 1], [], []>} : vector<2x32xf32>, vector<32x8xf32>, vector<2x8xf32> -> vector<2x8xf32>
    %17 = vector.broadcast %5 : vector<1x8xf32> to vector<2x8xf32>
    %18 = arith.addf %16, %17 : vector<2x8xf32>
    %19 = arith.index_cast %c0_i32 : i32 to index
    %c0_18 = arith.constant 0 : index
    %c0_19 = arith.constant 0 : index
    %20 = vector.load %arg6[%19, %c0_18, %c0_19] : memref<8x2x8xf32, #tpu.memory_space<vmem>>, vector<1x2x8xf32>
    %21 = vector.shape_cast %20 : vector<1x2x8xf32> to vector<2x8xf32>
    %22 = vector.shape_cast %18 : vector<2x8xf32> to vector<1x2x8xf32>
    tpu.vector_store %arg6[%19, %c0_18, %c0_19], %22 {strides = array<i32>} : memref<8x2x8xf32, #tpu.memory_space<vmem>>, vector<1x2x8xf32>,
    %c1_i32 = arith.constant 1 : i32
    %23 = arith.index_cast %c1_i32 : i32 to index
    %c0_20 = arith.constant 0 : index
    %c0_21 = arith.constant 0 : index
    %24 = vector.load %arg1[%23, %c0_20, %c0_21] : memref<8x2x16xf32, #tpu.memory_space<vmem>>, vector<1x2x16xf32>
    %25 = vector.shape_cast %24 : vector<1x2x16xf32> to vector<2x16xf32>
    %c0_22 = arith.constant 0 : index
    %c0_23 = arith.constant 0 : index
    %26 = vector.load %arg7[%c0_22, %c0_23] : memref<2x160xf32, #tpu.memory_space<vmem>>, vector<2x16xf32>
    tpu.vector_store %arg7[%c0_22, %c0_23], %25 {strides = array<i32>} : memref<2x160xf32, #tpu.memory_space<vmem>>, vector<2x16xf32>,
    %c0_24 = arith.constant 0 : index
    %c0_25 = arith.constant 0 : index
    %27 = vector.load %arg7[%c0_24, %c0_25] : memref<2x160xf32, #tpu.memory_space<vmem>>, vector<2x160xf32>
    %cst_26 = arith.constant dense<0.000000e+00> : vector<2x32xf32>
    %28 = tpu.matmul %27, %2, %cst_26 {dimension_numbers = #tpu.dot_dimension_numbers<[1], [0], [0], [1], [0, 0, 1, 1], [], []>} : vector<2x160xf32>, vector<160x32xf32>, vector<2x32xf32> -> vector<2x32xf32>
    %29 = vector.broadcast %3 : vector<1x32xf32> to vector<2x32xf32>
    %30 = arith.addf %28, %29 : vector<2x32xf32>
    %31 = math.tanh %30 : vector<2x32xf32>
    %c0_27 = arith.constant 0 : index
    %c128_28 = arith.constant 128 : index
    %32 = vector.load %arg7[%c0_27, %c128_28] : memref<2x160xf32, #tpu.memory_space<vmem>>, vector<2x32xf32>
    tpu.vector_store %arg7[%c0_27, %c128_28], %31 {strides = array<i32>} : memref<2x160xf32, #tpu.memory_space<vmem>>, vector<2x32xf32>,
    %cst_29 = arith.constant dense<0.000000e+00> : vector<2x8xf32>
    %33 = tpu.matmul %31, %4, %cst_29 {dimension_numbers = #tpu.dot_dimension_numbers<[1], [0], [0], [1], [0, 0, 1, 1], [], []>} : vector<2x32xf32>, vector<32x8xf32>, vector<2x8xf32> -> vector<2x8xf32>
    %34 = vector.broadcast %5 : vector<1x8xf32> to vector<2x8xf32>
    %35 = arith.addf %33, %34 : vector<2x8xf32>
    %36 = arith.index_cast %c1_i32 : i32 to index
    %c0_30 = arith.constant 0 : index
    %c0_31 = arith.constant 0 : index
    %37 = vector.load %arg6[%36, %c0_30, %c0_31] : memref<8x2x8xf32, #tpu.memory_space<vmem>>, vector<1x2x8xf32>
    %38 = vector.shape_cast %37 : vector<1x2x8xf32> to vector<2x8xf32>
    %39 = vector.shape_cast %35 : vector<2x8xf32> to vector<1x2x8xf32>
    tpu.vector_store %arg6[%36, %c0_30, %c0_31], %39 {strides = array<i32>} : memref<8x2x8xf32, #tpu.memory_space<vmem>>, vector<1x2x8xf32>,
    %c2_i32 = arith.constant 2 : i32
    %40 = arith.index_cast %c2_i32 : i32 to index
    %c0_32 = arith.constant 0 : index
    %c0_33 = arith.constant 0 : index
    %41 = vector.load %arg1[%40, %c0_32, %c0_33] : memref<8x2x16xf32, #tpu.memory_space<vmem>>, vector<1x2x16xf32>
    %42 = vector.shape_cast %41 : vector<1x2x16xf32> to vector<2x16xf32>
    %c0_34 = arith.constant 0 : index
    %c0_35 = arith.constant 0 : index
    %43 = vector.load %arg7[%c0_34, %c0_35] : memref<2x160xf32, #tpu.memory_space<vmem>>, vector<2x16xf32>
    tpu.vector_store %arg7[%c0_34, %c0_35], %42 {strides = array<i32>} : memref<2x160xf32, #tpu.memory_space<vmem>>, vector<2x16xf32>,
    %c0_36 = arith.constant 0 : index
    %c0_37 = arith.constant 0 : index
    %44 = vector.load %arg7[%c0_36, %c0_37] : memref<2x160xf32, #tpu.memory_space<vmem>>, vector<2x160xf32>
    %cst_38 = arith.constant dense<0.000000e+00> : vector<2x32xf32>
    %45 = tpu.matmul %44, %2, %cst_38 {dimension_numbers = #tpu.dot_dimension_numbers<[1], [0], [0], [1], [0, 0, 1, 1], [], []>} : vector<2x160xf32>, vector<160x32xf32>, vector<2x32xf32> -> vector<2x32xf32>
    %46 = vector.broadcast %3 : vector<1x32xf32> to vector<2x32xf32>
    %47 = arith.addf %45, %46 : vector<2x32xf32>
    %48 = math.tanh %47 : vector<2x32xf32>
    %c0_39 = arith.constant 0 : index
    %c128_40 = arith.constant 128 : index
    %49 = vector.load %arg7[%c0_39, %c128_40] : memref<2x160xf32, #tpu.memory_space<vmem>>, vector<2x32xf32>
    tpu.vector_store %arg7[%c0_39, %c128_40], %48 {strides = array<i32>} : memref<2x160xf32, #tpu.memory_space<vmem>>, vector<2x32xf32>,
    %cst_41 = arith.constant dense<0.000000e+00> : vector<2x8xf32>
    %50 = tpu.matmul %48, %4, %cst_41 {dimension_numbers = #tpu.dot_dimension_numbers<[1], [0], [0], [1], [0, 0, 1, 1], [], []>} : vector<2x32xf32>, vector<32x8xf32>, vector<2x8xf32> -> vector<2x8xf32>
    %51 = vector.broadcast %5 : vector<1x8xf32> to vector<2x8xf32>
    %52 = arith.addf %50, %51 : vector<2x8xf32>
    %53 = arith.index_cast %c2_i32 : i32 to index
    %c0_42 = arith.constant 0 : index
    %c0_43 = arith.constant 0 : index
    %54 = vector.load %arg6[%53, %c0_42, %c0_43] : memref<8x2x8xf32, #tpu.memory_space<vmem>>, vector<1x2x8xf32>
    %55 = vector.shape_cast %54 : vector<1x2x8xf32> to vector<2x8xf32>
    %56 = vector.shape_cast %52 : vector<2x8xf32> to vector<1x2x8xf32>
    tpu.vector_store %arg6[%53, %c0_42, %c0_43], %56 {strides = array<i32>} : memref<8x2x8xf32, #tpu.memory_space<vmem>>, vector<1x2x8xf32>,
    %c3_i32 = arith.constant 3 : i32
    %57 = arith.index_cast %c3_i32 : i32 to index
    %c0_44 = arith.constant 0 : index
    %c0_45 = arith.constant 0 : index
    %58 = vector.load %arg1[%57, %c0_44, %c0_45] : memref<8x2x16xf32, #tpu.memory_space<vmem>>, vector<1x2x16xf32>
    %59 = vector.shape_cast %58 : vector<1x2x16xf32> to vector<2x16xf32>
    %c0_46 = arith.constant 0 : index
    %c0_47 = arith.constant 0 : index
    %60 = vector.load %arg7[%c0_46, %c0_47] : memref<2x160xf32, #tpu.memory_space<vmem>>, vector<2x16xf32>
    tpu.vector_store %arg7[%c0_46, %c0_47], %59 {strides = array<i32>} : memref<2x160xf32, #tpu.memory_space<vmem>>, vector<2x16xf32>,
    %c0_48 = arith.constant 0 : index
    %c0_49 = arith.constant 0 : index
    %61 = vector.load %arg7[%c0_48, %c0_49] : memref<2x160xf32, #tpu.memory_space<vmem>>, vector<2x160xf32>
    %cst_50 = arith.constant dense<0.000000e+00> : vector<2x32xf32>
    %62 = tpu.matmul %61, %2, %cst_50 {dimension_numbers = #tpu.dot_dimension_numbers<[1], [0], [0], [1], [0, 0, 1, 1], [], []>} : vector<2x160xf32>, vector<160x32xf32>, vector<2x32xf32> -> vector<2x32xf32>
    %63 = vector.broadcast %3 : vector<1x32xf32> to vector<2x32xf32>
    %64 = arith.addf %62, %63 : vector<2x32xf32>
    %65 = math.tanh %64 : vector<2x32xf32>
    %c0_51 = arith.constant 0 : index
    %c128_52 = arith.constant 128 : index
    %66 = vector.load %arg7[%c0_51, %c128_52] : memref<2x160xf32, #tpu.memory_space<vmem>>, vector<2x32xf32>
    tpu.vector_store %arg7[%c0_51, %c128_52], %65 {strides = array<i32>} : memref<2x160xf32, #tpu.memory_space<vmem>>, vector<2x32xf32>,
    %cst_53 = arith.constant dense<0.000000e+00> : vector<2x8xf32>
    %67 = tpu.matmul %65, %4, %cst_53 {dimension_numbers = #tpu.dot_dimension_numbers<[1], [0], [0], [1], [0, 0, 1, 1], [], []>} : vector<2x32xf32>, vector<32x8xf32>, vector<2x8xf32> -> vector<2x8xf32>
    %68 = vector.broadcast %5 : vector<1x8xf32> to vector<2x8xf32>
    %69 = arith.addf %67, %68 : vector<2x8xf32>
    %70 = arith.index_cast %c3_i32 : i32 to index
    %c0_54 = arith.constant 0 : index
    %c0_55 = arith.constant 0 : index
    %71 = vector.load %arg6[%70, %c0_54, %c0_55] : memref<8x2x8xf32, #tpu.memory_space<vmem>>, vector<1x2x8xf32>
    %72 = vector.shape_cast %71 : vector<1x2x8xf32> to vector<2x8xf32>
    %73 = vector.shape_cast %69 : vector<2x8xf32> to vector<1x2x8xf32>
    tpu.vector_store %arg6[%70, %c0_54, %c0_55], %73 {strides = array<i32>} : memref<8x2x8xf32, #tpu.memory_space<vmem>>, vector<1x2x8xf32>,
    %c4_i32 = arith.constant 4 : i32
    %74 = arith.index_cast %c4_i32 : i32 to index
    %c0_56 = arith.constant 0 : index
    %c0_57 = arith.constant 0 : index
    %75 = vector.load %arg1[%74, %c0_56, %c0_57] : memref<8x2x16xf32, #tpu.memory_space<vmem>>, vector<1x2x16xf32>
    %76 = vector.shape_cast %75 : vector<1x2x16xf32> to vector<2x16xf32>
    %c0_58 = arith.constant 0 : index
    %c0_59 = arith.constant 0 : index
    %77 = vector.load %arg7[%c0_58, %c0_59] : memref<2x160xf32, #tpu.memory_space<vmem>>, vector<2x16xf32>
    tpu.vector_store %arg7[%c0_58, %c0_59], %76 {strides = array<i32>} : memref<2x160xf32, #tpu.memory_space<vmem>>, vector<2x16xf32>,
    %c0_60 = arith.constant 0 : index
    %c0_61 = arith.constant 0 : index
    %78 = vector.load %arg7[%c0_60, %c0_61] : memref<2x160xf32, #tpu.memory_space<vmem>>, vector<2x160xf32>
    %cst_62 = arith.constant dense<0.000000e+00> : vector<2x32xf32>
    %79 = tpu.matmul %78, %2, %cst_62 {dimension_numbers = #tpu.dot_dimension_numbers<[1], [0], [0], [1], [0, 0, 1, 1], [], []>} : vector<2x160xf32>, vector<160x32xf32>, vector<2x32xf32> -> vector<2x32xf32>
    %80 = vector.broadcast %3 : vector<1x32xf32> to vector<2x32xf32>
    %81 = arith.addf %79, %80 : vector<2x32xf32>
    %82 = math.tanh %81 : vector<2x32xf32>
    %c0_63 = arith.constant 0 : index
    %c128_64 = arith.constant 128 : index
    %83 = vector.load %arg7[%c0_63, %c128_64] : memref<2x160xf32, #tpu.memory_space<vmem>>, vector<2x32xf32>
    tpu.vector_store %arg7[%c0_63, %c128_64], %82 {strides = array<i32>} : memref<2x160xf32, #tpu.memory_space<vmem>>, vector<2x32xf32>,
    %cst_65 = arith.constant dense<0.000000e+00> : vector<2x8xf32>
    %84 = tpu.matmul %82, %4, %cst_65 {dimension_numbers = #tpu.dot_dimension_numbers<[1], [0], [0], [1], [0, 0, 1, 1], [], []>} : vector<2x32xf32>, vector<32x8xf32>, vector<2x8xf32> -> vector<2x8xf32>
    %85 = vector.broadcast %5 : vector<1x8xf32> to vector<2x8xf32>
    %86 = arith.addf %84, %85 : vector<2x8xf32>
    %87 = arith.index_cast %c4_i32 : i32 to index
    %c0_66 = arith.constant 0 : index
    %c0_67 = arith.constant 0 : index
    %88 = vector.load %arg6[%87, %c0_66, %c0_67] : memref<8x2x8xf32, #tpu.memory_space<vmem>>, vector<1x2x8xf32>
    %89 = vector.shape_cast %88 : vector<1x2x8xf32> to vector<2x8xf32>
    %90 = vector.shape_cast %86 : vector<2x8xf32> to vector<1x2x8xf32>
    tpu.vector_store %arg6[%87, %c0_66, %c0_67], %90 {strides = array<i32>} : memref<8x2x8xf32, #tpu.memory_space<vmem>>, vector<1x2x8xf32>,
    %c5_i32 = arith.constant 5 : i32
    %91 = arith.index_cast %c5_i32 : i32 to index
    %c0_68 = arith.constant 0 : index
    %c0_69 = arith.constant 0 : index
    %92 = vector.load %arg1[%91, %c0_68, %c0_69] : memref<8x2x16xf32, #tpu.memory_space<vmem>>, vector<1x2x16xf32>
    %93 = vector.shape_cast %92 : vector<1x2x16xf32> to vector<2x16xf32>
    %c0_70 = arith.constant 0 : index
    %c0_71 = arith.constant 0 : index
    %94 = vector.load %arg7[%c0_70, %c0_71] : memref<2x160xf32, #tpu.memory_space<vmem>>, vector<2x16xf32>
    tpu.vector_store %arg7[%c0_70, %c0_71], %93 {strides = array<i32>} : memref<2x160xf32, #tpu.memory_space<vmem>>, vector<2x16xf32>,
    %c0_72 = arith.constant 0 : index
    %c0_73 = arith.constant 0 : index
    %95 = vector.load %arg7[%c0_72, %c0_73] : memref<2x160xf32, #tpu.memory_space<vmem>>, vector<2x160xf32>
    %cst_74 = arith.constant dense<0.000000e+00> : vector<2x32xf32>
    %96 = tpu.matmul %95, %2, %cst_74 {dimension_numbers = #tpu.dot_dimension_numbers<[1], [0], [0], [1], [0, 0, 1, 1], [], []>} : vector<2x160xf32>, vector<160x32xf32>, vector<2x32xf32> -> vector<2x32xf32>
    %97 = vector.broadcast %3 : vector<1x32xf32> to vector<2x32xf32>
    %98 = arith.addf %96, %97 : vector<2x32xf32>
    %99 = math.tanh %98 : vector<2x32xf32>
    %c0_75 = arith.constant 0 : index
    %c128_76 = arith.constant 128 : index
    %100 = vector.load %arg7[%c0_75, %c128_76] : memref<2x160xf32, #tpu.memory_space<vmem>>, vector<2x32xf32>
    tpu.vector_store %arg7[%c0_75, %c128_76], %99 {strides = array<i32>} : memref<2x160xf32, #tpu.memory_space<vmem>>, vector<2x32xf32>,
    %cst_77 = arith.constant dense<0.000000e+00> : vector<2x8xf32>
    %101 = tpu.matmul %99, %4, %cst_77 {dimension_numbers = #tpu.dot_dimension_numbers<[1], [0], [0], [1], [0, 0, 1, 1], [], []>} : vector<2x32xf32>, vector<32x8xf32>, vector<2x8xf32> -> vector<2x8xf32>
    %102 = vector.broadcast %5 : vector<1x8xf32> to vector<2x8xf32>
    %103 = arith.addf %101, %102 : vector<2x8xf32>
    %104 = arith.index_cast %c5_i32 : i32 to index
    %c0_78 = arith.constant 0 : index
    %c0_79 = arith.constant 0 : index
    %105 = vector.load %arg6[%104, %c0_78, %c0_79] : memref<8x2x8xf32, #tpu.memory_space<vmem>>, vector<1x2x8xf32>
    %106 = vector.shape_cast %105 : vector<1x2x8xf32> to vector<2x8xf32>
    %107 = vector.shape_cast %103 : vector<2x8xf32> to vector<1x2x8xf32>
    tpu.vector_store %arg6[%104, %c0_78, %c0_79], %107 {strides = array<i32>} : memref<8x2x8xf32, #tpu.memory_space<vmem>>, vector<1x2x8xf32>,
    %c6_i32 = arith.constant 6 : i32
    %108 = arith.index_cast %c6_i32 : i32 to index
    %c0_80 = arith.constant 0 : index
    %c0_81 = arith.constant 0 : index
    %109 = vector.load %arg1[%108, %c0_80, %c0_81] : memref<8x2x16xf32, #tpu.memory_space<vmem>>, vector<1x2x16xf32>
    %110 = vector.shape_cast %109 : vector<1x2x16xf32> to vector<2x16xf32>
    %c0_82 = arith.constant 0 : index
    %c0_83 = arith.constant 0 : index
    %111 = vector.load %arg7[%c0_82, %c0_83] : memref<2x160xf32, #tpu.memory_space<vmem>>, vector<2x16xf32>
    tpu.vector_store %arg7[%c0_82, %c0_83], %110 {strides = array<i32>} : memref<2x160xf32, #tpu.memory_space<vmem>>, vector<2x16xf32>,
    %c0_84 = arith.constant 0 : index
    %c0_85 = arith.constant 0 : index
    %112 = vector.load %arg7[%c0_84, %c0_85] : memref<2x160xf32, #tpu.memory_space<vmem>>, vector<2x160xf32>
    %cst_86 = arith.constant dense<0.000000e+00> : vector<2x32xf32>
    %113 = tpu.matmul %112, %2, %cst_86 {dimension_numbers = #tpu.dot_dimension_numbers<[1], [0], [0], [1], [0, 0, 1, 1], [], []>} : vector<2x160xf32>, vector<160x32xf32>, vector<2x32xf32> -> vector<2x32xf32>
    %114 = vector.broadcast %3 : vector<1x32xf32> to vector<2x32xf32>
    %115 = arith.addf %113, %114 : vector<2x32xf32>
    %116 = math.tanh %115 : vector<2x32xf32>
    %c0_87 = arith.constant 0 : index
    %c128_88 = arith.constant 128 : index
    %117 = vector.load %arg7[%c0_87, %c128_88] : memref<2x160xf32, #tpu.memory_space<vmem>>, vector<2x32xf32>
    tpu.vector_store %arg7[%c0_87, %c128_88], %116 {strides = array<i32>} : memref<2x160xf32, #tpu.memory_space<vmem>>, vector<2x32xf32>,
    %cst_89 = arith.constant dense<0.000000e+00> : vector<2x8xf32>
    %118 = tpu.matmul %116, %4, %cst_89 {dimension_numbers = #tpu.dot_dimension_numbers<[1], [0], [0], [1], [0, 0, 1, 1], [], []>} : vector<2x32xf32>, vector<32x8xf32>, vector<2x8xf32> -> vector<2x8xf32>
    %119 = vector.broadcast %5 : vector<1x8xf32> to vector<2x8xf32>
    %120 = arith.addf %118, %119 : vector<2x8xf32>
    %121 = arith.index_cast %c6_i32 : i32 to index
    %c0_90 = arith.constant 0 : index
    %c0_91 = arith.constant 0 : index
    %122 = vector.load %arg6[%121, %c0_90, %c0_91] : memref<8x2x8xf32, #tpu.memory_space<vmem>>, vector<1x2x8xf32>
    %123 = vector.shape_cast %122 : vector<1x2x8xf32> to vector<2x8xf32>
    %124 = vector.shape_cast %120 : vector<2x8xf32> to vector<1x2x8xf32>
    tpu.vector_store %arg6[%121, %c0_90, %c0_91], %124 {strides = array<i32>} : memref<8x2x8xf32, #tpu.memory_space<vmem>>, vector<1x2x8xf32>,
    %c7_i32 = arith.constant 7 : i32
    %125 = arith.index_cast %c7_i32 : i32 to index
    %c0_92 = arith.constant 0 : index
    %c0_93 = arith.constant 0 : index
    %126 = vector.load %arg1[%125, %c0_92, %c0_93] : memref<8x2x16xf32, #tpu.memory_space<vmem>>, vector<1x2x16xf32>
    %127 = vector.shape_cast %126 : vector<1x2x16xf32> to vector<2x16xf32>
    %c0_94 = arith.constant 0 : index
    %c0_95 = arith.constant 0 : index
    %128 = vector.load %arg7[%c0_94, %c0_95] : memref<2x160xf32, #tpu.memory_space<vmem>>, vector<2x16xf32>
    tpu.vector_store %arg7[%c0_94, %c0_95], %127 {strides = array<i32>} : memref<2x160xf32, #tpu.memory_space<vmem>>, vector<2x16xf32>,
    %c0_96 = arith.constant 0 : index
    %c0_97 = arith.constant 0 : index
    %129 = vector.load %arg7[%c0_96, %c0_97] : memref<2x160xf32, #tpu.memory_space<vmem>>, vector<2x160xf32>
    %cst_98 = arith.constant dense<0.000000e+00> : vector<2x32xf32>
    %130 = tpu.matmul %129, %2, %cst_98 {dimension_numbers = #tpu.dot_dimension_numbers<[1], [0], [0], [1], [0, 0, 1, 1], [], []>} : vector<2x160xf32>, vector<160x32xf32>, vector<2x32xf32> -> vector<2x32xf32>
    %131 = vector.broadcast %3 : vector<1x32xf32> to vector<2x32xf32>
    %132 = arith.addf %130, %131 : vector<2x32xf32>
    %133 = math.tanh %132 : vector<2x32xf32>
    %c0_99 = arith.constant 0 : index
    %c128_100 = arith.constant 128 : index
    %134 = vector.load %arg7[%c0_99, %c128_100] : memref<2x160xf32, #tpu.memory_space<vmem>>, vector<2x32xf32>
    tpu.vector_store %arg7[%c0_99, %c128_100], %133 {strides = array<i32>} : memref<2x160xf32, #tpu.memory_space<vmem>>, vector<2x32xf32>,
    %cst_101 = arith.constant dense<0.000000e+00> : vector<2x8xf32>
    %135 = tpu.matmul %133, %4, %cst_101 {dimension_numbers = #tpu.dot_dimension_numbers<[1], [0], [0], [1], [0, 0, 1, 1], [], []>} : vector<2x32xf32>, vector<32x8xf32>, vector<2x8xf32> -> vector<2x8xf32>
    %136 = vector.broadcast %5 : vector<1x8xf32> to vector<2x8xf32>
    %137 = arith.addf %135, %136 : vector<2x8xf32>
    %138 = arith.index_cast %c7_i32 : i32 to index
    %c0_102 = arith.constant 0 : index
    %c0_103 = arith.constant 0 : index
    %139 = vector.load %arg6[%138, %c0_102, %c0_103] : memref<8x2x8xf32, #tpu.memory_space<vmem>>, vector<1x2x8xf32>
    %140 = vector.shape_cast %139 : vector<1x2x8xf32> to vector<2x8xf32>
    %141 = vector.shape_cast %137 : vector<2x8xf32> to vector<1x2x8xf32>
    tpu.vector_store %arg6[%138, %c0_102, %c0_103], %141 {strides = array<i32>} : memref<8x2x8xf32, #tpu.memory_space<vmem>>, vector<1x2x8xf32>,
    %c8_i32 = arith.constant 8 : i32
    return
  }
  func.func @transform_0(%arg0: i32) -> (i32, i32, i32) {
    %c0_i32 = arith.constant 0 : i32
    %c0_i32_0 = arith.constant 0 : i32
    %c0_i32_1 = arith.constant 0 : i32
    %c0_i32_2 = arith.constant 0 : i32
    return %c0_i32, %c0_i32_0, %c0_i32_1 : i32, i32, i32
  }
  func.func @transform_1(%arg0: i32) -> (i32, i32) {
    %c0_i32 = arith.constant 0 : i32
    %c0_i32_0 = arith.constant 0 : i32
    %c0_i32_1 = arith.constant 0 : i32
    return %c0_i32, %c0_i32_0 : i32, i32
  }
  func.func @transform_2(%arg0: i32) -> (i32, i32) {
    %c0_i32 = arith.constant 0 : i32
    %c0_i32_0 = arith.constant 0 : i32
    %c0_i32_1 = arith.constant 0 : i32
    return %c0_i32, %c0_i32_0 : i32, i32
  }
  func.func @transform_3(%arg0: i32) -> (i32, i32) {
    %c0_i32 = arith.constant 0 : i32
    %c0_i32_0 = arith.constant 0 : i32
    %c0_i32_1 = arith.constant 0 : i32
    return %c0_i32, %c0_i32_0 : i32, i32
  }
  func.func @transform_4(%arg0: i32) -> (i32, i32) {
    %c0_i32 = arith.constant 0 : i32
    %c0_i32_0 = arith.constant 0 : i32
    %c0_i32_1 = arith.constant 0 : i32
    return %c0_i32, %c0_i32_0 : i32, i32
  }
  func.func @transform_5(%arg0: i32) -> (i32, i32, i32) {
    %c0_i32 = arith.constant 0 : i32
    %c0_i32_0 = arith.constant 0 : i32
    %c0_i32_1 = arith.constant 0 : i32
    %c0_i32_2 = arith.constant 0 : i32
    return %c0_i32, %c0_i32_0, %c0_i32_1 : i32, i32, i32
  }
}

</mosaic_0001>

<bundles_post_ra>
// kernel: tpu_custom_call.1
= control target key start
LH: loop header
LB: loop body
LE: loop exit
PB: predicated region body
PF: predicated region fallthrough
CT: control target
= control target key end

     0   :  { %vm21_vm0 = vcmask 1041408   ;;  %vm22_vm1 = vcmask 257026   ;;  %vm52_vm2 = vcmask 123904   ;;  %v772_v9 = vmov 0.0   ;;  %s1211_s0 = inlined_call_operand.vmem [shape: f32[8,2,16], index: 0, kind: input, shape index: {}]   ;;  %s1212_s1 = inlined_call_operand.vmem [shape: f32[160,32], index: 1, kind: input, shape index: {}]   ;;  %s1213_s2 = inlined_call_operand.vmem [shape: f32[1,32], index: 2, kind: input, shape index: {}]   ;;  %s1214_s3 = inlined_call_operand.vmem [shape: f32[32,8], index: 3, kind: input, shape index: {}]   ;;  %s1215_s4 = inlined_call_operand.vmem [shape: f32[1,8], index: 4, kind: input, shape index: {}]   ;;  %s1216_s5 = inlined_call_operand.hbm [shape: f32[8,2,8], index: 5, kind: output, shape index: {}]  }
   0x1   :  { %v809_v0 = vld [vmem:[%s1212_s1 + $0x78] sm:$0xff]  ;;  %v814_v1 = vld [vmem:[%s1212_s1 + $0x70] sm:$0xff]  ;;  %v821_v2 = vld [vmem:[%s1212_s1 + $0x68] sm:$0xff] }
   0x2   :  { %66 = vmatpush.msra.mxu0 %v809_v0  ;;  %148 = vmatpush.msra.mxu3 %v809_v0  ;;  %v828_v3 = vld [vmem:[%s1212_s1 + $0x60] sm:$0xff]  ;;  %v833_v4 = vld [vmem:[%s1212_s1 + $0x98] sm:$0xff]  ;;  %v845_v6 = vld [vmem:[%s1212_s1 + $0x90] sm:$0xff] }
   0x3   :  { %v839_v5 = vld [vmem:[%s1212_s1 + $0x58] sm:$0xff]  ;;  %98 = vmatpush.msra.mxu1 %v833_v4  ;;  %v850_v7 = vld [vmem:[%s1212_s1 + $0x88] sm:$0xff]  ;;  %vm23_vm3 = vmor %vm22_vm1, %vm21_vm0 }
   0x4   :  { %67 = vmatpush.msra.mxu0 %v814_v1  ;;  %149 = vmatpush.msra.mxu3 %v814_v1  ;;  %v51_v8 = vld [vmem:[%s1211_s0] sm:$0x3]  ;;  %24 = vst.msk [vmem:[#allocation2] sm:$0xf] %vm23_vm3, %v772_v9  ;;  %v861_v10 = vld [vmem:[%s1212_s1 + $0x50] sm:$0xff] }
   0x5   :  { %99 = vmatpush.msra.mxu1 %v845_v6  ;;  %53 = vst.msk [vmem:[#allocation2] sm:$0x3] %vm52_vm2, %v51_v8  ;;  %v867_v11 = vld [vmem:[%s1212_s1 + $0x80] sm:$0xff] }
   0x6   :  { %68 = vmatpush.msra.mxu0 %v821_v2  ;;  %150 = vmatpush.msra.mxu3 %v821_v2 }
   0x7   :  { %100 = vmatpush.msra.mxu1 %v850_v7 }
   0x8   :  { %69 = vmatpush.msra.mxu0 %v828_v3  ;;  %151 = vmatpush.msra.mxu3 %v828_v3 }
   0xa   :  { %70 = vmatpush.msra.mxu0 %v839_v5 }
   0xb   :  { %10 = vsyncpa [#allocation4], 0  ;;  %v875_v12 = vld [vmem:[%s1212_s1 + $0x48] sm:$0xff]  ;;  %152 = vmatpush.msra.mxu3 %v839_v5  ;;  %101 = vmatpush.msra.mxu1 %v867_v11  ;;  %v883_v13 = vld [vmem:[%s1212_s1 + $0x40] sm:$0xff]  ;;  %vm63_vm4 = vcmask 261120   ;;  %vm107_vm5 = vcmask 254976  }
   0xc   :  { %71 = vmatpush.msra.mxu0 %v861_v10  ;;  %v891_v14 = vld [vmem:[%s1212_s1 + $0x38] sm:$0xff]  ;;  %v54_v15 = vld [vmem:[#allocation2] sm:$0xf]  ;;  %v899_v16 = vld [vmem:[%s1212_s1 + $0x30] sm:$0xff]  ;;  %vm135_vm6 = vcmask 58368   ;;  %s774_s10 = smov 32  }
   0xd   :  { %153 = vmatpush.msra.mxu3 %v861_v10  ;;  %180 = vmatpush.msrb.mxu1 %v833_v4  ;;  %59 = vst [vmem:[#allocation1] ss:$4 sm:$0xff] %v54_v15  ;;  %v907_v17 = vld [vmem:[%s1212_s1 + $0x28] sm:$0xff]  ;;  %v915_v18 = vld [vmem:[%s1212_s1 + $0x20] sm:$0xff]  ;;  %v922_v19 = vld [vmem:[%s1212_s1 + $0x18] sm:$0xff]  ;;  %s775_s11 = smov 2  }
   0xe   :  { %72 = vmatpush.msra.mxu0 %v875_v12  ;;  %v929_v21 = vld [vmem:[%s1212_s1 + $0x10] sm:$0xff]  ;;  %v938_v22 = vld [vmem:[%s1212_s1 + $0x8] sm:$0xff]  ;;  %v946_v23 = vld [vmem:[%s1212_s1] sm:$0xff]  ;;  %s689_s1 = sshll.u32 %s1216_s5, 4  ;;  %s690_s1 = int_to_ptr.hbm [resolvable:$true] %s689_s1 }
   0xf   :  { %154 = vmatpush.msra.mxu3 %v875_v12  ;;  %181 = vmatpush.msrb.mxu1 %v845_v6  ;;  %v1002_v25 = vld [vmem:[%s1214_s3 + $0x18] sm:$0xff]  ;;  %v1009_v26 = vld [vmem:[%s1214_s3 + $0x10] sm:$0xff]  ;;  %v1016_v27 = vld [vmem:[%s1214_s3 + $0x8] sm:$0xff] }
  0x10   :  { %73 = vmatpush.msra.mxu0 %v883_v13  ;;  %127 = vmatpush.msra.mxu2 %v1002_v25  ;;  %v703_v28 = vld [vmem:[%s1211_s0 + $0x2] sm:$0x3]  ;;  %v1038_v30 = vld [vmem:[%s1213_s2] ss:$0 sm:$0xff]  ;;  %v706_v36 = vld [vmem:[%s1211_s0 + $0x4] sm:$0x3] }
  0x11   :  { %155 = vmatpush.msra.mxu3 %v883_v13  ;;  %182 = vmatpush.msrb.mxu1 %v850_v7  ;;  %v1026_v29 = vld [vmem:[%s1214_s3] sm:$0xff]  ;;  %139 = vst.msk [vmem:[#allocation2] sm:$0x3] %vm52_vm2, %v703_v28  ;;  %v712_v59 = vld [vmem:[%s1211_s0 + $0x8] sm:$0x3] }
  0x12   :  { %74 = vmatpush.msra.mxu0 %v891_v14  ;;  %128 = vmatpush.msra.mxu2 %v1009_v26  ;;  %v1063_v40 = vld [vmem:[%s1215_s4] ss:$0 sm:$0xff]  ;;  %v709_v51 = vld [vmem:[%s1211_s0 + $0x6] sm:$0x3] }
  0x13   :  { %156 = vmatpush.msra.mxu3 %v891_v14  ;;  %183 = vmatpush.msrb.mxu1 %v867_v11 }
  0x14   :  { %75 = vmatpush.msra.mxu0 %v899_v16  ;;  %v61_v20 = vld.sshfl [vmem:[#allocation1 + $0x8] sm:$0xff pattern:$0x73625140]  ;;  %v60_v24 = vld.sshfl [vmem:[#allocation1] sm:$0xff pattern:$0x73625140]  ;;  %129 = vmatpush.msra.mxu2 %v1016_v27 }
  0x15   :  { %157 = vmatpush.msra.mxu3 %v899_v16  ;;  %701 = vmatmul.msk.f32.vlgmr.msra.gmra.mxu1 %vm63_vm4, %v61_v20 }
  0x16   :  { %76 = vmatpush.msra.mxu0 %v907_v17  ;;  %226 = vmatpush.msra.mxu1 %v809_v0 }
  0x17   :  { %158 = vmatpush.msra.mxu3 %v907_v17  ;;  %130 = vmatpush.msra.mxu2 %v1026_v29 }
  0x18   :  { %77 = vmatpush.msra.mxu0 %v915_v18  ;;  %227 = vmatpush.msra.mxu1 %v814_v1 }
  0x19   :  { %159 = vmatpush.msra.mxu3 %v915_v18  ;;  %205 = vmatpush.msrb.mxu2 %v1002_v25 }
  0x1a   :  { %78 = vmatpush.msra.mxu0 %v922_v19  ;;  %228 = vmatpush.msra.mxu1 %v821_v2 }
  0x1b   :  { %160 = vmatpush.msra.mxu3 %v922_v19  ;;  %206 = vmatpush.msrb.mxu2 %v1009_v26 }
  0x1c   :  { %79 = vmatpush.msra.mxu0 %v929_v21  ;;  %229 = vmatpush.msra.mxu1 %v828_v3 }
  0x1d   :  { %161 = vmatpush.msra.mxu3 %v929_v21  ;;  %207 = vmatpush.msrb.mxu2 %v1016_v27 }
  0x1e   :  { %80 = vmatpush.msra.mxu0 %v938_v22  ;;  %230 = vmatpush.msra.mxu1 %v839_v5 }
  0x1f   :  { %162 = vmatpush.msra.mxu3 %v938_v22  ;;  %208 = vmatpush.msrb.mxu2 %v1026_v29 }
  0x20   :  { %81 = vmatpush.msra.mxu0 %v946_v23  ;;  %231 = vmatpush.msra.mxu1 %v861_v10 }
  0x21   :  { %82 = vmatmul.f32.vlgmr.msra.gmra.mxu0 %v60_v24  ;;  %163 = vmatpush.msra.mxu3 %v946_v23 }
  0x22   :  { %304 = vmatpush.msrb.mxu0 %v809_v0  ;;  %232 = vmatpush.msra.mxu1 %v875_v12 }
  0x23   :  { %361 = vmatpush.msrb.mxu3 %v1002_v25 }
  0x24   :  { %305 = vmatpush.msrb.mxu0 %v814_v1  ;;  %233 = vmatpush.msra.mxu1 %v883_v13 }
  0x25   :  { %362 = vmatpush.msrb.mxu3 %v1009_v26 }
  0x26   :  { %306 = vmatpush.msrb.mxu0 %v821_v2  ;;  %234 = vmatpush.msra.mxu1 %v891_v14 }
  0x27   :  { %363 = vmatpush.msrb.mxu3 %v1016_v27 }
  0x28   :  { %307 = vmatpush.msrb.mxu0 %v828_v3  ;;  %235 = vmatpush.msra.mxu1 %v899_v16 }
  0x29   :  { %364 = vmatpush.msrb.mxu3 %v1026_v29 }
  0x2a   :  { %308 = vmatpush.msrb.mxu0 %v839_v5  ;;  %236 = vmatpush.msra.mxu1 %v907_v17 }
  0x2c   :  { %309 = vmatpush.msrb.mxu0 %v861_v10  ;;  %237 = vmatpush.msra.mxu1 %v915_v18 }
  0x2e   :  { %310 = vmatpush.msrb.mxu0 %v875_v12  ;;  %238 = vmatpush.msra.mxu1 %v922_v19 }
  0x30   :  { %311 = vmatpush.msrb.mxu0 %v883_v13  ;;  %239 = vmatpush.msra.mxu1 %v929_v21 }
  0x32   :  { %312 = vmatpush.msrb.mxu0 %v891_v14  ;;  %240 = vmatpush.msra.mxu1 %v938_v22 }
  0x34   :  { %313 = vmatpush.msrb.mxu0 %v899_v16  ;;  %241 = vmatpush.msra.mxu1 %v946_v23 }
  0x36   :  { %314 = vmatpush.msrb.mxu0 %v907_v17 }
  0x38   :  { %315 = vmatpush.msrb.mxu0 %v915_v18 }
  0x3a   :  { %316 = vmatpush.msrb.mxu0 %v922_v19 }
  0x3c   :  { %317 = vmatpush.msrb.mxu0 %v929_v21 }
  0x3e   :  { %318 = vmatpush.msrb.mxu0 %v938_v22 }
  0x40   :  { %319 = vmatpush.msrb.mxu0 %v946_v23 }
  0x42   :  { %616 = vmatpush.msra.mxu0 %v809_v0 }
  0x44   :  { %617 = vmatpush.msra.mxu0 %v814_v1 }
  0x46   :  { %618 = vmatpush.msra.mxu0 %v821_v2 }
  0x48   :  { %619 = vmatpush.msra.mxu0 %v828_v3 }
  0x4a   :  { %620 = vmatpush.msra.mxu0 %v839_v5 }
  0x4c   :  { %621 = vmatpush.msra.mxu0 %v861_v10 }
  0x4e   :  { %622 = vmatpush.msra.mxu0 %v875_v12 }
  0x50   :  { %623 = vmatpush.msra.mxu0 %v883_v13 }
  0x52   :  { %624 = vmatpush.msra.mxu0 %v891_v14 }
  0x54   :  { %625 = vmatpush.msra.mxu0 %v899_v16 }
  0x56   :  { %626 = vmatpush.msra.mxu0 %v907_v17 }
  0x58   :  { %627 = vmatpush.msra.mxu0 %v915_v18 }
  0x5a   :  { %628 = vmatpush.msra.mxu0 %v922_v19 }
  0x5c   :  { %629 = vmatpush.msra.mxu0 %v929_v21 }
  0x5e   :  { %630 = vmatpush.msra.mxu0 %v938_v22 }
  0x60   :  { %631 = vmatpush.msra.mxu0 %v946_v23 }
  0x92   :  { %v103_v32 = vpop.f32.mrf.mxu1 }
  0x9e   :  { %v83_v31 = vpop.f32.mrf.mxu0 }
  0x9f   :  { %v84_v33 = vadd.f32 %v1038_v30, %v83_v31  ;;  %v715_v31 = vld [vmem:[%s1211_s0 + $0xa] sm:$0x3] }
  0xa1   :  { %v104_v34 = vadd.f32 %v103_v32, %v84_v33 }
  0xa3   :  { %730 = vtanh.f32 %v104_v34 }
  0xa9   :  { %v731_v35 = vpop.eup %730 }
  0xaa   :  { %108 = vst.msk [vmem:[#allocation2 + $0x2] sm:$0x3] %vm107_vm5, %v731_v35  ;;  %702 = vmatmul.msk.f32.vlgmr.msra.gmra.mxu2 %vm63_vm4, %v731_v35 }
  0xab   :  { %258 = vmatpush.msra.mxu2 %v833_v4 }
  0xad   :  { %259 = vmatpush.msra.mxu2 %v845_v6 }
  0xaf   :  { %260 = vmatpush.msra.mxu2 %v850_v7 }
  0xb1   :  { %v140_v37 = vld [vmem:[#allocation2] sm:$0xf]  ;;  %261 = vmatpush.msra.mxu2 %v867_v11 }
  0xb2   :  { %217 = vst.msk [vmem:[#allocation2] sm:$0x3] %vm52_vm2, %v706_v36 }
  0xb3   :  { %142 = vst [vmem:[#allocation1] ss:$4 sm:$0xff] %v140_v37 }
  0xba   :  { %v143_v38 = vld.sshfl [vmem:[#allocation1] sm:$0xff pattern:$0x73625140]  ;;  %v144_v39 = vld.sshfl [vmem:[#allocation1 + $0x8] sm:$0xff pattern:$0x73625140] }
  0xbb   :  { %164 = vmatmul.f32.vlgmr.msra.gmra.mxu3 %v143_v38  ;;  %704 = vmatmul.msk.f32.vlgmr.msrb.gmra.mxu1 %vm63_vm4, %v144_v39 }
  0xbc   :  { %414 = vmatpush.msra.mxu3 %v833_v4  ;;  %439 = vmatpush.msrb.mxu1 %v1002_v25 }
  0xbe   :  { %415 = vmatpush.msra.mxu3 %v845_v6  ;;  %440 = vmatpush.msrb.mxu1 %v1009_v26 }
  0xc0   :  { %416 = vmatpush.msra.mxu3 %v850_v7  ;;  %441 = vmatpush.msrb.mxu1 %v1016_v27 }
  0xc2   :  { %417 = vmatpush.msra.mxu3 %v867_v11  ;;  %442 = vmatpush.msrb.mxu1 %v1026_v29 }
 0x12d   :  { %v132_v41 = vpop.f32.mrf.mxu2 }
 0x12e   :  { %v133_v42 = vadd.f32 %v1063_v40, %v132_v41 }
 0x130   :  { %136 = vst.msk [vmem:[#allocation3] sm:$0x3] %vm135_vm6, %v133_v42 }
 0x138   :  { %v185_v45 = vpop.f32.mrf.mxu1 }
 0x13e   :  { %v165_v43 = vpop.f32.mrf.mxu3 }
 0x13f   :  { %v166_v44 = vadd.f32 %v1038_v30, %v165_v43  ;;  %v718_v43 = vld [vmem:[%s1211_s0 + $0xc] sm:$0x3] }
 0x141   :  { %v186_v46 = vadd.f32 %v185_v45, %v166_v44 }
 0x143   :  { %732 = vtanh.f32 %v186_v46 }
 0x149   :  { %v733_v47 = vpop.eup %732 }
 0x14a   :  { %189 = vst.msk [vmem:[#allocation2 + $0x2] sm:$0x3] %vm107_vm5, %v733_v47  ;;  %705 = vmatmul.msk.f32.vlgmr.msrb.gmra.mxu2 %vm63_vm4, %v733_v47 }
 0x14b   :  { %283 = vmatpush.msrb.mxu2 %v1002_v25 }
 0x14d   :  { %284 = vmatpush.msrb.mxu2 %v1009_v26 }
 0x14f   :  { %285 = vmatpush.msrb.mxu2 %v1016_v27 }
 0x151   :  { %v218_v48 = vld [vmem:[#allocation2] sm:$0xf]  ;;  %286 = vmatpush.msrb.mxu2 %v1026_v29 }
 0x152   :  { %220 = vst [vmem:[#allocation1] ss:$4 sm:$0xff] %v218_v48 }
 0x153   :  { %295 = vst.msk [vmem:[#allocation2] sm:$0x3] %vm52_vm2, %v709_v51 }
 0x159   :  { %v221_v49 = vld.sshfl [vmem:[#allocation1] sm:$0xff pattern:$0x73625140]  ;;  %v222_v50 = vld.sshfl [vmem:[#allocation1 + $0x8] sm:$0xff pattern:$0x73625140] }
 0x15a   :  { %242 = vmatmul.f32.vlgmr.msra.gmra.mxu1 %v221_v49  ;;  %707 = vmatmul.msk.f32.vlgmr.msra.gmra.mxu2 %vm63_vm4, %v222_v50 }
 0x15b   :  { %336 = vmatpush.msra.mxu2 %v833_v4  ;;  %492 = vmatpush.msra.mxu1 %v833_v4 }
 0x15d   :  { %337 = vmatpush.msra.mxu2 %v845_v6  ;;  %493 = vmatpush.msra.mxu1 %v845_v6 }
 0x15f   :  { %338 = vmatpush.msra.mxu2 %v850_v7  ;;  %494 = vmatpush.msra.mxu1 %v850_v7 }
 0x161   :  { %339 = vmatpush.msra.mxu2 %v867_v11  ;;  %495 = vmatpush.msra.mxu1 %v867_v11 }
 0x1cd   :  { %v210_v52 = vpop.f32.mrf.mxu2 }
 0x1ce   :  { %v211_v53 = vadd.f32 %v1063_v40, %v210_v52 }
 0x1d0   :  { %214 = vst.msk [vmem:[#allocation3 + $0x2] sm:$0x3] %vm135_vm6, %v211_v53 }
 0x1d7   :  { %v243_v54 = vpop.f32.mrf.mxu1 }
 0x1d8   :  { %v244_v55 = vadd.f32 %v1038_v30, %v243_v54 }
 0x1dd   :  { %v263_v56 = vpop.f32.mrf.mxu2 }
 0x1de   :  { %v264_v57 = vadd.f32 %v263_v56, %v244_v55 }
 0x1e0   :  { %734 = vtanh.f32 %v264_v57 }
 0x1e6   :  { %v735_v58 = vpop.eup %734 }
 0x1e7   :  { %267 = vst.msk [vmem:[#allocation2 + $0x2] sm:$0x3] %vm107_vm5, %v735_v58  ;;  %708 = vmatmul.msk.f32.vlgmr.msrb.gmra.mxu2 %vm63_vm4, %v735_v58 }
 0x1e8   :  { %382 = vmatpush.msrb.mxu2 %v809_v0 }
 0x1ea   :  { %383 = vmatpush.msrb.mxu2 %v814_v1 }
 0x1ec   :  { %384 = vmatpush.msrb.mxu2 %v821_v2 }
 0x1ee   :  { %v296_v60 = vld [vmem:[#allocation2] sm:$0xf]  ;;  %385 = vmatpush.msrb.mxu2 %v828_v3 }
 0x1ef   :  { %298 = vst [vmem:[#allocation1] ss:$4 sm:$0xff] %v296_v60 }
 0x1f0   :  { %373 = vst.msk [vmem:[#allocation2] sm:$0x3] %vm52_vm2, %v712_v59  ;;  %386 = vmatpush.msrb.mxu2 %v839_v5 }
 0x1f2   :  { %387 = vmatpush.msrb.mxu2 %v861_v10 }
 0x1f4   :  { %388 = vmatpush.msrb.mxu2 %v875_v12 }
 0x1f6   :  { %v299_v61 = vld.sshfl [vmem:[#allocation1] sm:$0xff pattern:$0x73625140]  ;;  %v300_v62 = vld.sshfl [vmem:[#allocation1 + $0x8] sm:$0xff pattern:$0x73625140]  ;;  %389 = vmatpush.msrb.mxu2 %v883_v13 }
 0x1f7   :  { %320 = vmatmul.f32.vlgmr.msrb.gmra.mxu0 %v299_v61  ;;  %710 = vmatmul.msk.f32.vlgmr.msra.gmra.mxu2 %vm63_vm4, %v300_v62 }
 0x1f8   :  { %390 = vmatpush.msrb.mxu2 %v891_v14 }
 0x1fa   :  { %391 = vmatpush.msrb.mxu2 %v899_v16 }
 0x1fc   :  { %392 = vmatpush.msrb.mxu2 %v907_v17 }
 0x1fe   :  { %393 = vmatpush.msrb.mxu2 %v915_v18 }
 0x200   :  { %394 = vmatpush.msrb.mxu2 %v922_v19 }
 0x202   :  { %395 = vmatpush.msrb.mxu2 %v929_v21 }
 0x204   :  { %396 = vmatpush.msrb.mxu2 %v938_v22 }
 0x206   :  { %397 = vmatpush.msrb.mxu2 %v946_v23 }
 0x208   :  { %517 = vmatpush.msra.mxu2 %v1002_v25 }
 0x20a   :  { %518 = vmatpush.msra.mxu2 %v1009_v26 }
 0x20c   :  { %519 = vmatpush.msra.mxu2 %v1016_v27 }
 0x20e   :  { %520 = vmatpush.msra.mxu2 %v1026_v29 }
 0x26a   :  { %v288_v63 = vpop.f32.mrf.mxu2 }
 0x26b   :  { %v289_v8 = vadd.f32 %v1063_v40, %v288_v63 }
 0x26d   :  { %292 = vst.msk [vmem:[#allocation3 + $0x4] sm:$0x3] %vm135_vm6, %v289_v8 }
 0x274   :  { %v321_v9 = vpop.f32.mrf.mxu0 }
 0x275   :  { %v322_v15 = vadd.f32 %v1038_v30, %v321_v9 }
 0x27a   :  { %v341_v20 = vpop.f32.mrf.mxu2 }
 0x27b   :  { %v342_v24 = vadd.f32 %v341_v20, %v322_v15 }
 0x27d   :  { %736 = vtanh.f32 %v342_v24 }
 0x283   :  { %v737_v28 = vpop.eup %736 }
 0x284   :  { %345 = vst.msk [vmem:[#allocation2 + $0x2] sm:$0x3] %vm107_vm5, %v737_v28  ;;  %711 = vmatmul.msk.f32.vlgmr.msrb.gmra.mxu3 %vm63_vm4, %v737_v28 }
 0x285   :  { %460 = vmatpush.msrb.mxu3 %v809_v0 }
 0x287   :  { %461 = vmatpush.msrb.mxu3 %v814_v1 }
 0x289   :  { %462 = vmatpush.msrb.mxu3 %v821_v2 }
 0x28b   :  { %v374_v32 = vld [vmem:[#allocation2] sm:$0xf]  ;;  %463 = vmatpush.msrb.mxu3 %v828_v3 }
 0x28c   :  { %376 = vst [vmem:[#allocation1] ss:$4 sm:$0xff] %v374_v32 }
 0x28d   :  { %451 = vst.msk [vmem:[#allocation2] sm:$0x3] %vm52_vm2, %v715_v31  ;;  %464 = vmatpush.msrb.mxu3 %v839_v5 }
 0x28f   :  { %465 = vmatpush.msrb.mxu3 %v861_v10 }
 0x291   :  { %466 = vmatpush.msrb.mxu3 %v875_v12 }
 0x293   :  { %v377_v33 = vld.sshfl [vmem:[#allocation1] sm:$0xff pattern:$0x73625140]  ;;  %v378_v34 = vld.sshfl [vmem:[#allocation1 + $0x8] sm:$0xff pattern:$0x73625140]  ;;  %467 = vmatpush.msrb.mxu3 %v883_v13 }
 0x294   :  { %398 = vmatmul.f32.vlgmr.msrb.gmra.mxu2 %v377_v33  ;;  %713 = vmatmul.msk.f32.vlgmr.msra.gmra.mxu3 %vm63_vm4, %v378_v34 }
 0x295   :  { %468 = vmatpush.msrb.mxu3 %v891_v14  ;;  %595 = vmatpush.msrb.mxu2 %v1002_v25 }
 0x297   :  { %469 = vmatpush.msrb.mxu3 %v899_v16  ;;  %596 = vmatpush.msrb.mxu2 %v1009_v26 }
 0x299   :  { %470 = vmatpush.msrb.mxu3 %v907_v17  ;;  %597 = vmatpush.msrb.mxu2 %v1016_v27 }
 0x29b   :  { %471 = vmatpush.msrb.mxu3 %v915_v18  ;;  %598 = vmatpush.msrb.mxu2 %v1026_v29 }
 0x29d   :  { %472 = vmatpush.msrb.mxu3 %v922_v19 }
 0x29f   :  { %473 = vmatpush.msrb.mxu3 %v929_v21 }
 0x2a1   :  { %474 = vmatpush.msrb.mxu3 %v938_v22 }
 0x2a3   :  { %475 = vmatpush.msrb.mxu3 %v946_v23 }
 0x2a5   :  { %570 = vmatpush.msra.mxu3 %v833_v4 }
 0x2a7   :  { %571 = vmatpush.msra.mxu3 %v845_v6 }
 0x2a9   :  { %572 = vmatpush.msra.mxu3 %v850_v7 }
 0x2ab   :  { %573 = vmatpush.msra.mxu3 %v867_v11 }
 0x307   :  { %v366_v35 = vpop.f32.mrf.mxu3 }
 0x308   :  { %v367_v36 = vadd.f32 %v1063_v40, %v366_v35 }
 0x30a   :  { %370 = vst.msk [vmem:[#allocation3 + $0x6] sm:$0x3] %vm135_vm6, %v367_v36 }
 0x317   :  { %v399_v37 = vpop.f32.mrf.mxu2  ;;  %v419_v39 = vpop.f32.mrf.mxu3 }
 0x318   :  { %v400_v38 = vadd.f32 %v1038_v30, %v399_v37 }
 0x31a   :  { %v420_v41 = vadd.f32 %v419_v39, %v400_v38 }
 0x31c   :  { %738 = vtanh.f32 %v420_v41 }
 0x322   :  { %v739_v42 = vpop.eup %738 }
 0x323   :  { %423 = vst.msk [vmem:[#allocation2 + $0x2] sm:$0x3] %vm107_vm5, %v739_v42  ;;  %714 = vmatmul.msk.f32.vlgmr.msrb.gmra.mxu1 %vm63_vm4, %v739_v42 }
 0x324   :  { %538 = vmatpush.msrb.mxu1 %v809_v0 }
 0x326   :  { %539 = vmatpush.msrb.mxu1 %v814_v1 }
 0x328   :  { %540 = vmatpush.msrb.mxu1 %v821_v2 }
 0x32a   :  { %v452_v44 = vld [vmem:[#allocation2] sm:$0xf]  ;;  %541 = vmatpush.msrb.mxu1 %v828_v3 }
 0x32b   :  { %454 = vst [vmem:[#allocation1] ss:$4 sm:$0xff] %v452_v44 }
 0x32c   :  { %529 = vst.msk [vmem:[#allocation2] sm:$0x3] %vm52_vm2, %v718_v43  ;;  %542 = vmatpush.msrb.mxu1 %v839_v5 }
 0x32e   :  { %543 = vmatpush.msrb.mxu1 %v861_v10 }
 0x330   :  { %544 = vmatpush.msrb.mxu1 %v875_v12 }
 0x332   :  { %v455_v0 = vld.sshfl [vmem:[#allocation1] sm:$0xff pattern:$0x73625140]  ;;  %v456_v1 = vld.sshfl [vmem:[#allocation1 + $0x8] sm:$0xff pattern:$0x73625140]  ;;  %545 = vmatpush.msrb.mxu1 %v883_v13 }
 0x333   :  { %476 = vmatmul.f32.vlgmr.msrb.gmra.mxu3 %v455_v0  ;;  %716 = vmatmul.msk.f32.vlgmr.msra.gmra.mxu1 %vm63_vm4, %v456_v1 }
 0x334   :  { %546 = vmatpush.msrb.mxu1 %v891_v14  ;;  %673 = vmatpush.msrb.mxu3 %v1002_v25 }
 0x336   :  { %547 = vmatpush.msrb.mxu1 %v899_v16  ;;  %674 = vmatpush.msrb.mxu3 %v1009_v26  ;;  %v721_v16 = vld [vmem:[%s1211_s0 + $0xe] sm:$0x3]  ;;  %s773_s0 = smov [#allocation3]  }
 0x337   :  { %s687_s7 = sshll.u32 %s773_s0, 4  ;;  %s688_s7 = int_to_ptr.vmem [resolvable:$true] %s687_s7 }
 0x338   :  { %548 = vmatpush.msrb.mxu1 %v907_v17  ;;  %675 = vmatpush.msrb.mxu3 %v1016_v27 }
 0x33a   :  { %549 = vmatpush.msrb.mxu1 %v915_v18  ;;  %676 = vmatpush.msrb.mxu3 %v1026_v29 }
 0x33c   :  { %550 = vmatpush.msrb.mxu1 %v922_v19 }
 0x33e   :  { %551 = vmatpush.msrb.mxu1 %v929_v21 }
 0x340   :  { %552 = vmatpush.msrb.mxu1 %v938_v22 }
 0x342   :  { %553 = vmatpush.msrb.mxu1 %v946_v23 }
 0x3a0   :  { %v444_v2 = vpop.f32.mrf.mxu1 }
 0x3a1   :  { %v445_v3 = vadd.f32 %v1063_v40, %v444_v2 }
 0x3a3   :  { %448 = vst.msk [vmem:[#allocation3 + $0x8] sm:$0x3] %vm135_vm6, %v445_v3 }
 0x3b0   :  { %v497_v12 = vpop.f32.mrf.mxu1 }
 0x3b6   :  { %v477_v5 = vpop.f32.mrf.mxu3 }
 0x3b7   :  { %v478_v10 = vadd.f32 %v1038_v30, %v477_v5 }
 0x3b9   :  { %v498_v13 = vadd.f32 %v497_v12, %v478_v10 }
 0x3bb   :  { %740 = vtanh.f32 %v498_v13 }
 0x3c1   :  { %v741_v14 = vpop.eup %740 }
 0x3c2   :  { %501 = vst.msk [vmem:[#allocation2 + $0x2] sm:$0x3] %vm107_vm5, %v741_v14  ;;  %717 = vmatmul.msk.f32.vlgmr.msra.gmra.mxu2 %vm63_vm4, %v741_v14 }
 0x3c3   :  { %648 = vmatpush.msra.mxu2 %v833_v4 }
 0x3c5   :  { %649 = vmatpush.msra.mxu2 %v845_v6 }
 0x3c7   :  { %650 = vmatpush.msra.mxu2 %v850_v7 }
 0x3c9   :  { %v530_v17 = vld [vmem:[#allocation2] sm:$0xf]  ;;  %651 = vmatpush.msra.mxu2 %v867_v11 }
 0x3ca   :  { %532 = vst [vmem:[#allocation1] ss:$4 sm:$0xff] %v530_v17 }
 0x3cb   :  { %607 = vst.msk [vmem:[#allocation2] sm:$0x3] %vm52_vm2, %v721_v16 }
 0x3d1   :  { %v533_v18 = vld.sshfl [vmem:[#allocation1] sm:$0xff pattern:$0x73625140]  ;;  %v534_v19 = vld.sshfl [vmem:[#allocation1 + $0x8] sm:$0xff pattern:$0x73625140] }
 0x3d2   :  { %554 = vmatmul.f32.vlgmr.msrb.gmra.mxu1 %v533_v18  ;;  %719 = vmatmul.msk.f32.vlgmr.msra.gmra.mxu3 %vm63_vm4, %v534_v19 }
 0x445   :  { %v522_v4 = vpop.f32.mrf.mxu2 }
 0x446   :  { %v523_v6 = vadd.f32 %v1063_v40, %v522_v4 }
 0x448   :  { %526 = vst.msk [vmem:[#allocation3 + $0xa] sm:$0x3] %vm135_vm6, %v523_v6 }
 0x44f   :  { %v555_v7 = vpop.f32.mrf.mxu1 }
 0x450   :  { %v556_v21 = vadd.f32 %v1038_v30, %v555_v7 }
 0x455   :  { %v575_v22 = vpop.f32.mrf.mxu3 }
 0x456   :  { %v576_v23 = vadd.f32 %v575_v22, %v556_v21 }
 0x458   :  { %742 = vtanh.f32 %v576_v23 }
 0x45e   :  { %v743_v11 = vpop.eup %742 }
 0x45f   :  { %579 = vst.msk [vmem:[#allocation2 + $0x2] sm:$0x3] %vm107_vm5, %v743_v11  ;;  %720 = vmatmul.msk.f32.vlgmr.msrb.gmra.mxu2 %vm63_vm4, %v743_v11 }
 0x466   :  { %v608_v25 = vld [vmem:[#allocation2] sm:$0xf] }
 0x467   :  { %610 = vst [vmem:[#allocation1] ss:$4 sm:$0xff] %v608_v25 }
 0x46e   :  { %v611_v26 = vld.sshfl [vmem:[#allocation1] sm:$0xff pattern:$0x73625140]  ;;  %v612_v27 = vld.sshfl [vmem:[#allocation1 + $0x8] sm:$0xff pattern:$0x73625140] }
 0x46f   :  { %632 = vmatmul.f32.vlgmr.msra.gmra.mxu0 %v611_v26  ;;  %722 = vmatmul.msk.f32.vlgmr.msra.gmra.mxu2 %vm63_vm4, %v612_v27 }
 0x4e2   :  { %v600_v29 = vpop.f32.mrf.mxu2 }
 0x4e3   :  { %v601_v45 = vadd.f32 %v1063_v40, %v600_v29 }
 0x4e5   :  { %604 = vst.msk [vmem:[#allocation3 + $0xc] sm:$0x3] %vm135_vm6, %v601_v45 }
 0x4ec   :  { %v633_v46 = vpop.f32.mrf.mxu0 }
 0x4ed   :  { %v634_v47 = vadd.f32 %v1038_v30, %v633_v46 }
 0x4f2   :  { %v653_v48 = vpop.f32.mrf.mxu2 }
 0x4f3   :  { %v654_v49 = vadd.f32 %v653_v48, %v634_v47 }
 0x4f5   :  { %744 = vtanh.f32 %v654_v49 }
 0x4fb   :  { %v745_v50 = vpop.eup %744 }
 0x4fc   :  { %657 = vst.msk [vmem:[#allocation2 + $0x2] sm:$0x3] %vm107_vm5, %v745_v50  ;;  %723 = vmatmul.msk.f32.vlgmr.msrb.gmra.mxu3 %vm63_vm4, %v745_v50 }
 0x57f   :  { %v678_v51 = vpop.f32.mrf.mxu3 }
 0x580   :  { %v679_v52 = vadd.f32 %v1063_v40, %v678_v51 }
 0x582   :  { %682 = vst.msk [vmem:[#allocation3 + $0xe] sm:$0x3] %vm135_vm6, %v679_v52 }
 0x583   :  { %695 = dma.vmem_to_hbm [thread:$0]  %s688_s7, 256, %s690_s1, [#allocation4], %s774_s10, %s774_s10, %s775_s11  }
 0x584   :  { %770 = dma.done.wait [#allocation4], 256  }
 0x585   :  { %771 = vsyncadd [#allocation4], 4294967040 }
 0x586   :  { %700 = vsyncpa [#allocation4], 1 }

</bundles_post_ra>
